<compile_context>
chip_gen: v6e
topology: v6e:2x2x1
jax: 0.10.0
libtpu: 0.0.40
codegen_flags: <defaults>
</compile_context>

<pallas_src>
import functools

import jax
import jax.numpy as jnp
from jax import lax
from jax.experimental import pallas as pl
from jax.experimental.pallas import tpu as pltpu


def _shift_lanes(h, off, hw):
    """t[:, p] = h[:, p + off] if 0 <= p + off < hw else 0 (static offset)."""
    if off == 0:
        return h
    ch = h.shape[0]
    zeros = jnp.zeros((ch, abs(off)), h.dtype)
    if off > 0:
        return jnp.concatenate([h[:, off:], zeros], axis=1)
    return jnp.concatenate([zeros, h[:, :hw + off]], axis=1)


def resblock_kernel(x_ref, w1_ref, s1_ref, b1_ref, w2_ref, s2_ref, b2_ref,
                    o_ref, *, width):
    # x_ref : (C, H*W)   one batch element (batch squeezed by BlockSpec)
    # w1_ref: (Ch, C)    1x1 conv weight, Ch = C // 2
    # s1/b1 : (Ch, 1)    folded BN1 scale / bias
    # w2_ref: (C, 9*Ch)  3x3 conv weight as (out, tap*in) for the fused matmul
    # s2/b2 : (C, 1)     folded BN2 scale / bias
    # o_ref : (C, H*W)
    C, HW = x_ref.shape
    Ch = w1_ref.shape[0]
    W = width

    x = x_ref[...].astype(jnp.float32)                        # (C, HW)

    # --- conv1: 1x1 conv == channel matmul (MXU), then BN1 + LeakyReLU(0.1) ---
    h = jnp.dot(w1_ref[...].astype(jnp.float32), x,
                preferred_element_type=jnp.float32)            # (Ch, HW)
    h = h * s1_ref[...] + b1_ref[...]                          # per-sublane FMA
    h = jnp.where(h > 0, h, 0.1 * h)

    # --- build im2col (9*Ch, HW) via zero-fill lane shifts + edge masks ------
    # Vertically out-of-bounds taps fall outside [0, HW) and are zero-filled by
    # the shift itself; only row wrap (left/right image edge) needs a mask.
    xx = lax.broadcasted_iota(jnp.int32, (1, HW), 1) % W       # pixel column
    not_left = xx >= 1                                         # valid for dx=-1
    not_right = xx < (W - 1)                                   # valid for dx=+1
    taps = []
    for dy in (-1, 0, 1):
        for dx in (-1, 0, 1):
            t = _shift_lanes(h, dy * W + dx, HW)
            if dx == -1:
                t = jnp.where(not_left, t, 0.0)
            elif dx == 1:
                t = jnp.where(not_right, t, 0.0)
            taps.append(t)
    im2col = jnp.concatenate(taps, axis=0)                     # (9*Ch, HW)

    # --- conv2: 3x3 conv fused into ONE matmul (K = 9*Ch), BN2 + LeakyReLU ---
    acc = jnp.dot(w2_ref[...].astype(jnp.float32), im2col,
                  preferred_element_type=jnp.float32)          # (C, HW)
    out = acc * s2_ref[...] + b2_ref[...]
    out = jnp.where(out > 0, out, 0.1 * out)

    # --- residual add; lane-dense store (HW is a multiple of 128) ------------
    o_ref[...] = (out + x).astype(o_ref.dtype)


def resblock_pallas(x_nchw, w1t, s1, b1, w2m, s2, b2):
    """x_nchw: (N, C, H, W) PyTorch layout. Weights pre-packed (see __main__)."""
    N, C, H, W = x_nchw.shape
    Ch = w1t.shape[0]
    HW = H * W
    x_flat = x_nchw.reshape(N, C, HW)   # free reshape, stays channels-major

    kernel = functools.partial(resblock_kernel, width=W)
    out = pl.pallas_call(
        kernel,
        out_shape=jax.ShapeDtypeStruct((N, C, HW), x_nchw.dtype),
        grid_spec=pltpu.PrefetchScalarGridSpec(
            num_scalar_prefetch=0,
            grid=(N,),
            in_specs=[
                pl.BlockSpec((None, C, HW), lambda n: (n, 0, 0)),
                pl.BlockSpec((Ch, C), lambda n: (0, 0)),
                pl.BlockSpec((Ch, 1), lambda n: (0, 0)),
                pl.BlockSpec((Ch, 1), lambda n: (0, 0)),
                pl.BlockSpec((C, 9 * Ch), lambda n: (0, 0)),
                pl.BlockSpec((C, 1), lambda n: (0, 0)),
                pl.BlockSpec((C, 1), lambda n: (0, 0)),
            ],
            out_specs=pl.BlockSpec((None, C, HW), lambda n: (n, 0, 0)),
        ),
        # Batch axis is fully independent -> shard across the 2 TensorCores on
        # v7x; neutral on v5e/v6e (single TC).
        compiler_params=pltpu.CompilerParams(
            dimension_semantics=("parallel",)),
    )(x_flat, w1t, s1, b1, w2m, s2, b2)
    return out.reshape(N, C, H, W)


def resblock_reference(x_nchw, w1_torch, s1, b1, w2_torch, s2, b2):
    """Pure-JAX reference on NCHW with PyTorch-layout weights."""
    dn = ("NCHW", "OIHW", "NCHW")
    h = lax.conv_general_dilated(x_nchw, w1_torch, (1, 1), "VALID",
                                 dimension_numbers=dn)
    h = h * s1.reshape(1, -1, 1, 1) + b1.reshape(1, -1, 1, 1)
    h = jnp.where(h > 0, h, 0.1 * h)
    o = lax.conv_general_dilated(h, w2_torch, (1, 1), [(1, 1), (1, 1)],
                                 dimension_numbers=dn)
    o = o * s2.reshape(1, -1, 1, 1) + b2.reshape(1, -1, 1, 1)
    o = jnp.where(o > 0, o, 0.1 * o)
    return o + x_nchw


def fold_bn(gamma, beta, mean, var, eps=1e-5):
    scale = gamma / jnp.sqrt(var + eps)
    bias = beta - mean * scale
    return scale, bias


if __name__ == "__main__":
    key = jax.random.PRNGKey(0)
    N, C, H, W = 2, 4, 16, 16        # channels=4 -> hidden channels=2
    Ch = C // 2

    ks = jax.random.split(key, 11)
    # PyTorch-layout input (NCHW) — kernel consumes it directly (no transpose).
    x_nchw = jax.random.normal(ks[0], (N, C, H, W), jnp.float32)

    # PyTorch-layout conv weights.
    w1_torch = jax.random.normal(ks[1], (Ch, C, 1, 1), jnp.float32) * 0.3
    w2_torch = jax.random.normal(ks[2], (C, Ch, 3, 3), jnp.float32) * 0.3

    # Deterministic BN params (inference mode), folded to scale/bias.
    g1 = 1.0 + 0.1 * jax.random.normal(ks[3], (Ch,), jnp.float32)
    be1 = 0.1 * jax.random.normal(ks[4], (Ch,), jnp.float32)
    m1 = 0.1 * jax.random.normal(ks[5], (Ch,), jnp.float32)
    v1 = 0.5 + jnp.abs(jax.random.normal(ks[6], (Ch,), jnp.float32))
    g2 = 1.0 + 0.1 * jax.random.normal(ks[7], (C,), jnp.float32)
    be2 = 0.1 * jax.random.normal(ks[8], (C,), jnp.float32)
    m2 = 0.1 * jax.random.normal(ks[9], (C,), jnp.float32)
    v2 = 0.5 + jnp.abs(jax.random.normal(ks[10], (C,), jnp.float32))

    s1, b1 = fold_bn(g1, be1, m1, v1)
    s2, b2 = fold_bn(g2, be2, m2, v2)

    # Kernel-layout weights:
    #   conv1: (Ch, C, 1, 1) -> (Ch, C)
    #   conv2: (C, Ch, 3, 3) -> (C, 3, 3, Ch) -> (C, 9*Ch), tap = (dy+1)*3+(dx+1)
    w1t = w1_torch[:, :, 0, 0]
    w2m = jnp.transpose(w2_torch, (0, 2, 3, 1)).reshape(C, 9 * Ch)

    out = resblock_pallas(x_nchw, w1t,
                          s1.reshape(Ch, 1), b1.reshape(Ch, 1),
                          w2m,
                          s2.reshape(C, 1), b2.reshape(C, 1))
    out = jax.block_until_ready(out)

    ref = resblock_reference(x_nchw, w1_torch, s1, b1, w2_torch, s2, b2)
    assert out.shape == (N, C, H, W)
    err = jnp.max(jnp.abs(out - ref))
    assert jnp.allclose(out, ref, rtol=1e-4, atol=1e-4), f"max err {err}"

    print("KERNEL_OK")
</pallas_src>

<mosaic_0001>
module attributes {stable_mosaic.version = 11 : i64} {
  func.func @resblock_kernel(%arg0: i32, %arg1: memref<1x4x256xf32, #tpu.memory_space<vmem>>, %arg2: memref<2x4xf32, #tpu.memory_space<vmem>>, %arg3: memref<2x1xf32, #tpu.memory_space<vmem>>, %arg4: memref<2x1xf32, #tpu.memory_space<vmem>>, %arg5: memref<4x18xf32, #tpu.memory_space<vmem>>, %arg6: memref<4x1xf32, #tpu.memory_space<vmem>>, %arg7: memref<4x1xf32, #tpu.memory_space<vmem>>, %arg8: memref<1x4x256xf32, #tpu.memory_space<vmem>>) attributes {dimension_semantics = [#tpu.dimension_semantics<parallel>], iteration_bounds = array<i64: 2>, scalar_prefetch = 0 : i64, scratch_operands = 0 : i64, tpu.core_type = #tpu.core_type<tc>, window_params = [{transform_indices = @transform_0, window_bounds = array<i64: 1, 4, 256>}, {pipeline_mode = #tpu.pipeline_mode<synchronous>, transform_indices = @transform_1, window_bounds = array<i64: 2, 4>}, {pipeline_mode = #tpu.pipeline_mode<synchronous>, transform_indices = @transform_2, window_bounds = array<i64: 2, 1>}, {pipeline_mode = #tpu.pipeline_mode<synchronous>, transform_indices = @transform_3, window_bounds = array<i64: 2, 1>}, {pipeline_mode = #tpu.pipeline_mode<synchronous>, transform_indices = @transform_4, window_bounds = array<i64: 4, 18>}, {pipeline_mode = #tpu.pipeline_mode<synchronous>, transform_indices = @transform_5, window_bounds = array<i64: 4, 1>}, {pipeline_mode = #tpu.pipeline_mode<synchronous>, transform_indices = @transform_6, window_bounds = array<i64: 4, 1>}, {transform_indices = @transform_7, window_bounds = array<i64: 1, 4, 256>}]} {
    %c0 = arith.constant 0 : index
    %c0_0 = arith.constant 0 : index
    %c0_1 = arith.constant 0 : index
    %0 = vector.load %arg1[%c0, %c0_0, %c0_1] : memref<1x4x256xf32, #tpu.memory_space<vmem>>, vector<1x4x256xf32>
    %1 = vector.shape_cast %0 : vector<1x4x256xf32> to vector<4x256xf32>
    %c0_2 = arith.constant 0 : index
    %c0_3 = arith.constant 0 : index
    %2 = vector.load %arg2[%c0_2, %c0_3] : memref<2x4xf32, #tpu.memory_space<vmem>>, vector<2x4xf32>
    %cst = arith.constant dense<0.000000e+00> : vector<2x256xf32>
    %3 = tpu.matmul %2, %1, %cst {dimension_numbers = #tpu.dot_dimension_numbers<[1], [0], [0], [1], [0, 0, 1, 1], [], []>} : vector<2x4xf32>, vector<4x256xf32>, vector<2x256xf32> -> vector<2x256xf32>
    %c0_4 = arith.constant 0 : index
    %c0_5 = arith.constant 0 : index
    %4 = vector.load %arg3[%c0_4, %c0_5] : memref<2x1xf32, #tpu.memory_space<vmem>>, vector<2x1xf32>
    %5 = vector.broadcast %4 : vector<2x1xf32> to vector<2x256xf32>
    %6 = arith.mulf %3, %5 : vector<2x256xf32>
    %c0_6 = arith.constant 0 : index
    %c0_7 = arith.constant 0 : index
    %7 = vector.load %arg4[%c0_6, %c0_7] : memref<2x1xf32, #tpu.memory_space<vmem>>, vector<2x1xf32>
    %8 = vector.broadcast %7 : vector<2x1xf32> to vector<2x256xf32>
    %9 = arith.addf %6, %8 : vector<2x256xf32>
    %cst_8 = arith.constant 0.000000e+00 : f32
    %10 = vector.broadcast %cst_8 : f32 to vector<2x256xf32>
    %11 = arith.cmpf ogt, %9, %10 : vector<2x256xf32>
    %cst_9 = arith.constant 1.000000e-01 : f32
    %12 = vector.broadcast %cst_9 : f32 to vector<2x256xf32>
    %13 = arith.mulf %12, %9 : vector<2x256xf32>
    %14 = arith.select %11, %9, %13 : vector<2x256xi1>, vector<2x256xf32>
    %15 = tpu.iota {dimensions = array<i32: 1>} : vector<1x256xi32>
    %c16_i32 = arith.constant 16 : i32
    %c0_i32 = arith.constant 0 : i32
    %16 = arith.cmpi eq, %c16_i32, %c0_i32 : i32
    %c1_i32 = arith.constant 1 : i32
    %17 = arith.select %16, %c1_i32, %c16_i32 : i32
    %18 = vector.broadcast %17 : i32 to vector<1x256xi32>
    %19 = arith.remsi %15, %18 : vector<1x256xi32>
    %c0_i32_10 = arith.constant 0 : i32
    %20 = vector.broadcast %c0_i32_10 : i32 to vector<1x256xi32>
    %21 = arith.cmpi ne, %19, %20 : vector<1x256xi32>
    %c0_i32_11 = arith.constant 0 : i32
    %22 = vector.broadcast %c0_i32_11 : i32 to vector<1x256xi32>
    %23 = arith.cmpi slt, %19, %22 : vector<1x256xi32>
    %c0_i32_12 = arith.constant 0 : i32
    %24 = arith.cmpi slt, %17, %c0_i32_12 : i32
    %25 = vector.broadcast %24 : i1 to vector<1x256xi1>
    %26 = vector.broadcast %25 : vector<1x256xi1> to vector<1x256xi1>
    %27 = arith.xori %23, %26 : vector<1x256xi1>
    %28 = arith.andi %27, %21 : vector<1x256xi1>
    %29 = vector.broadcast %17 : i32 to vector<1x256xi32>
    %30 = arith.addi %19, %29 : vector<1x256xi32>
    %31 = arith.select %28, %30, %19 : vector<1x256xi1>, vector<1x256xi32>
    %c1_i32_13 = arith.constant 1 : i32
    %32 = vector.broadcast %c1_i32_13 : i32 to vector<1x256xi32>
    %33 = arith.cmpi sge, %31, %32 : vector<1x256xi32>
    %c15_i32 = arith.constant 15 : i32
    %34 = vector.broadcast %c15_i32 : i32 to vector<1x256xi32>
    %35 = arith.cmpi slt, %31, %34 : vector<1x256xi32>
    %cst_14 = arith.constant 0.000000e+00 : f32
    %36 = vector.broadcast %cst_14 : f32 to vector<2x17xf32>
    %37 = vector.extract_strided_slice %14 {offsets = [0, 0], sizes = [2, 239], strides = [1, 1]} : vector<2x256xf32> to vector<2x239xf32>
    %38 = tpu.concatenate %36, %37 in 1 : vector<2x17xf32>, vector<2x239xf32> -> vector<2x256xf32>
    %cst_15 = arith.constant 0.000000e+00 : f32
    %39 = vector.shape_cast %33 : vector<1x256xi1> to vector<1x256xi1>
    %40 = vector.broadcast %39 : vector<1x256xi1> to vector<2x256xi1>
    %41 = vector.broadcast %cst_15 : f32 to vector<2x256xf32>
    %42 = arith.select %40, %38, %41 : vector<2x256xi1>, vector<2x256xf32>
    %cst_16 = arith.constant 0.000000e+00 : f32
    %43 = vector.broadcast %cst_16 : f32 to vector<2x16xf32>
    %44 = vector.extract_strided_slice %14 {offsets = [0, 0], sizes = [2, 240], strides = [1, 1]} : vector<2x256xf32> to vector<2x240xf32>
    %45 = tpu.concatenate %43, %44 in 1 : vector<2x16xf32>, vector<2x240xf32> -> vector<2x256xf32>
    %cst_17 = arith.constant 0.000000e+00 : f32
    %46 = vector.broadcast %cst_17 : f32 to vector<2x15xf32>
    %47 = vector.extract_strided_slice %14 {offsets = [0, 0], sizes = [2, 241], strides = [1, 1]} : vector<2x256xf32> to vector<2x241xf32>
    %48 = tpu.concatenate %46, %47 in 1 : vector<2x15xf32>, vector<2x241xf32> -> vector<2x256xf32>
    %cst_18 = arith.constant 0.000000e+00 : f32
    %49 = vector.shape_cast %35 : vector<1x256xi1> to vector<1x256xi1>
    %50 = vector.broadcast %49 : vector<1x256xi1> to vector<2x256xi1>
    %51 = vector.broadcast %cst_18 : f32 to vector<2x256xf32>
    %52 = arith.select %50, %48, %51 : vector<2x256xi1>, vector<2x256xf32>
    %cst_19 = arith.constant 0.000000e+00 : f32
    %53 = vector.broadcast %cst_19 : f32 to vector<2x1xf32>
    %54 = vector.extract_strided_slice %14 {offsets = [0, 0], sizes = [2, 255], strides = [1, 1]} : vector<2x256xf32> to vector<2x255xf32>
    %55 = tpu.concatenate %53, %54 in 1 : vector<2x1xf32>, vector<2x255xf32> -> vector<2x256xf32>
    %cst_20 = arith.constant 0.000000e+00 : f32
    %56 = vector.shape_cast %33 : vector<1x256xi1> to vector<1x256xi1>
    %57 = vector.broadcast %56 : vector<1x256xi1> to vector<2x256xi1>
    %58 = vector.broadcast %cst_20 : f32 to vector<2x256xf32>
    %59 = arith.select %57, %55, %58 : vector<2x256xi1>, vector<2x256xf32>
    %cst_21 = arith.constant 0.000000e+00 : f32
    %60 = vector.broadcast %cst_21 : f32 to vector<2x1xf32>
    %61 = vector.extract_strided_slice %14 {offsets = [0, 1], sizes = [2, 255], strides = [1, 1]} : vector<2x256xf32> to vector<2x255xf32>
    %62 = tpu.concatenate %61, %60 in 1 : vector<2x255xf32>, vector<2x1xf32> -> vector<2x256xf32>
    %cst_22 = arith.constant 0.000000e+00 : f32
    %63 = vector.shape_cast %35 : vector<1x256xi1> to vector<1x256xi1>
    %64 = vector.broadcast %63 : vector<1x256xi1> to vector<2x256xi1>
    %65 = vector.broadcast %cst_22 : f32 to vector<2x256xf32>
    %66 = arith.select %64, %62, %65 : vector<2x256xi1>, vector<2x256xf32>
    %cst_23 = arith.constant 0.000000e+00 : f32
    %67 = vector.broadcast %cst_23 : f32 to vector<2x15xf32>
    %68 = vector.extract_strided_slice %14 {offsets = [0, 15], sizes = [2, 241], strides = [1, 1]} : vector<2x256xf32> to vector<2x241xf32>
    %69 = tpu.concatenate %68, %67 in 1 : vector<2x241xf32>, vector<2x15xf32> -> vector<2x256xf32>
    %cst_24 = arith.constant 0.000000e+00 : f32
    %70 = vector.shape_cast %33 : vector<1x256xi1> to vector<1x256xi1>
    %71 = vector.broadcast %70 : vector<1x256xi1> to vector<2x256xi1>
    %72 = vector.broadcast %cst_24 : f32 to vector<2x256xf32>
    %73 = arith.select %71, %69, %72 : vector<2x256xi1>, vector<2x256xf32>
    %cst_25 = arith.constant 0.000000e+00 : f32
    %74 = vector.broadcast %cst_25 : f32 to vector<2x16xf32>
    %75 = vector.extract_strided_slice %14 {offsets = [0, 16], sizes = [2, 240], strides = [1, 1]} : vector<2x256xf32> to vector<2x240xf32>
    %76 = tpu.concatenate %75, %74 in 1 : vector<2x240xf32>, vector<2x16xf32> -> vector<2x256xf32>
    %cst_26 = arith.constant 0.000000e+00 : f32
    %77 = vector.broadcast %cst_26 : f32 to vector<2x17xf32>
    %78 = vector.extract_strided_slice %14 {offsets = [0, 17], sizes = [2, 239], strides = [1, 1]} : vector<2x256xf32> to vector<2x239xf32>
    %79 = tpu.concatenate %78, %77 in 1 : vector<2x239xf32>, vector<2x17xf32> -> vector<2x256xf32>
    %cst_27 = arith.constant 0.000000e+00 : f32
    %80 = vector.shape_cast %35 : vector<1x256xi1> to vector<1x256xi1>
    %81 = vector.broadcast %80 : vector<1x256xi1> to vector<2x256xi1>
    %82 = vector.broadcast %cst_27 : f32 to vector<2x256xf32>
    %83 = arith.select %81, %79, %82 : vector<2x256xi1>, vector<2x256xf32>
    %84 = tpu.concatenate %42, %45, %52, %59, %14, %66, %73, %76, %83 in 0 : vector<2x256xf32>, vector<2x256xf32>, vector<2x256xf32>, vector<2x256xf32>, vector<2x256xf32>, vector<2x256xf32>, vector<2x256xf32>, vector<2x256xf32>, vector<2x256xf32> -> vector<18x256xf32>
    %c0_28 = arith.constant 0 : index
    %c0_29 = arith.constant 0 : index
    %85 = vector.load %arg5[%c0_28, %c0_29] : memref<4x18xf32, #tpu.memory_space<vmem>>, vector<4x18xf32>
    %cst_30 = arith.constant dense<0.000000e+00> : vector<4x256xf32>
    %86 = tpu.matmul %85, %84, %cst_30 {dimension_numbers = #tpu.dot_dimension_numbers<[1], [0], [0], [1], [0, 0, 1, 1], [], []>} : vector<4x18xf32>, vector<18x256xf32>, vector<4x256xf32> -> vector<4x256xf32>
    %c0_31 = arith.constant 0 : index
    %c0_32 = arith.constant 0 : index
    %87 = vector.load %arg6[%c0_31, %c0_32] : memref<4x1xf32, #tpu.memory_space<vmem>>, vector<4x1xf32>
    %88 = vector.broadcast %87 : vector<4x1xf32> to vector<4x256xf32>
    %89 = arith.mulf %86, %88 : vector<4x256xf32>
    %c0_33 = arith.constant 0 : index
    %c0_34 = arith.constant 0 : index
    %90 = vector.load %arg7[%c0_33, %c0_34] : memref<4x1xf32, #tpu.memory_space<vmem>>, vector<4x1xf32>
    %91 = vector.broadcast %90 : vector<4x1xf32> to vector<4x256xf32>
    %92 = arith.addf %89, %91 : vector<4x256xf32>
    %cst_35 = arith.constant 0.000000e+00 : f32
    %93 = vector.broadcast %cst_35 : f32 to vector<4x256xf32>
    %94 = arith.cmpf ogt, %92, %93 : vector<4x256xf32>
    %cst_36 = arith.constant 1.000000e-01 : f32
    %95 = vector.broadcast %cst_36 : f32 to vector<4x256xf32>
    %96 = arith.mulf %95, %92 : vector<4x256xf32>
    %97 = arith.select %94, %92, %96 : vector<4x256xi1>, vector<4x256xf32>
    %98 = arith.addf %97, %1 : vector<4x256xf32>
    %c0_37 = arith.constant 0 : index
    %c0_38 = arith.constant 0 : index
    %c0_39 = arith.constant 0 : index
    %99 = vector.load %arg8[%c0_37, %c0_38, %c0_39] : memref<1x4x256xf32, #tpu.memory_space<vmem>>, vector<1x4x256xf32>
    %100 = vector.shape_cast %99 : vector<1x4x256xf32> to vector<4x256xf32>
    %101 = vector.shape_cast %98 : vector<4x256xf32> to vector<1x4x256xf32>
    tpu.vector_store %arg8[%c0_37, %c0_38, %c0_39], %101 {strides = array<i32>} : memref<1x4x256xf32, #tpu.memory_space<vmem>>, vector<1x4x256xf32>,
    return
  }
  func.func @transform_0(%arg0: i32) -> (i32, i32, i32) {
    %c0_i32 = arith.constant 0 : i32
    %c0_i32_0 = arith.constant 0 : i32
    %c0_i32_1 = arith.constant 0 : i32
    return %arg0, %c0_i32, %c0_i32_0 : i32, i32, i32
  }
  func.func @transform_1(%arg0: i32) -> (i32, i32) {
    %c0_i32 = arith.constant 0 : i32
    %c0_i32_0 = arith.constant 0 : i32
    %c0_i32_1 = arith.constant 0 : i32
    return %c0_i32, %c0_i32_0 : i32, i32
  }
  func.func @transform_2(%arg0: i32) -> (i32, i32) {
    %c0_i32 = arith.constant 0 : i32
    %c0_i32_0 = arith.constant 0 : i32
    %c0_i32_1 = arith.constant 0 : i32
    return %c0_i32, %c0_i32_0 : i32, i32
  }
  func.func @transform_3(%arg0: i32) -> (i32, i32) {
    %c0_i32 = arith.constant 0 : i32
    %c0_i32_0 = arith.constant 0 : i32
    %c0_i32_1 = arith.constant 0 : i32
    return %c0_i32, %c0_i32_0 : i32, i32
  }
  func.func @transform_4(%arg0: i32) -> (i32, i32) {
    %c0_i32 = arith.constant 0 : i32
    %c0_i32_0 = arith.constant 0 : i32
    %c0_i32_1 = arith.constant 0 : i32
    return %c0_i32, %c0_i32_0 : i32, i32
  }
  func.func @transform_5(%arg0: i32) -> (i32, i32) {
    %c0_i32 = arith.constant 0 : i32
    %c0_i32_0 = arith.constant 0 : i32
    %c0_i32_1 = arith.constant 0 : i32
    return %c0_i32, %c0_i32_0 : i32, i32
  }
  func.func @transform_6(%arg0: i32) -> (i32, i32) {
    %c0_i32 = arith.constant 0 : i32
    %c0_i32_0 = arith.constant 0 : i32
    %c0_i32_1 = arith.constant 0 : i32
    return %c0_i32, %c0_i32_0 : i32, i32
  }
  func.func @transform_7(%arg0: i32) -> (i32, i32, i32) {
    %c0_i32 = arith.constant 0 : i32
    %c0_i32_0 = arith.constant 0 : i32
    %c0_i32_1 = arith.constant 0 : i32
    return %arg0, %c0_i32, %c0_i32_0 : i32, i32, i32
  }
}

</mosaic_0001>

<bundles_post_ra>
// kernel: tpu_custom_call.1
= control target key start
LH: loop header
LB: loop body
LE: loop exit
PB: predicated region body
PF: predicated region fallthrough
CT: control target
= control target key end

     0   :  { %12 = vsyncpa [#allocation3], 0  ;;  %s1216_s0 = inlined_call_operand.vmem [shape: f32[2,4,256], index: 0, kind: input, shape index: {}]   ;;  %s1217_s1 = inlined_call_operand.hbm [shape: f32[2,4], index: 1, kind: input, shape index: {}]   ;;  %s1218_s2 = inlined_call_operand.vmem [shape: f32[2,1], index: 2, kind: input, shape index: {}]   ;;  %s1219_s3 = inlined_call_operand.vmem [shape: f32[2,1], index: 3, kind: input, shape index: {}]   ;;  %s1220_s4 = inlined_call_operand.vmem [shape: f32[4,18], index: 4, kind: input, shape index: {}]   ;;  %s1221_s5 = inlined_call_operand.vmem [shape: f32[4,1], index: 5, kind: input, shape index: {}]   ;;  %s1222_s6 = inlined_call_operand.vmem [shape: f32[4,1], index: 6, kind: input, shape index: {}]   ;;  %s1223_s7 = inlined_call_operand.hbm [shape: f32[2,4,256], index: 7, kind: output, shape index: {}]  }
   0x1   :  { %13 = vsyncpa [#allocation4], 0 }
   0x2   :  { %15 = vsyncpa [#allocation4 + $0x1], 0  ;;  %s994_s24 = smov 0   ;;  %s996_s25 = smov 0  }
   0x3   :  { %s998_s26 = smov 0   ;;  %s1000_s27 = smov 0  }
   0x4 LB: > { %s1015_s28 = sadd.s32 4294967295, %s940_s27   ;;  %s765_s29 = sadd.s32 4294967294, %s940_s27   ;;  %s940_s27 = sphi %s1000_s27, %s1239_s27   ;;  %s936_s26 = sphi %s998_s26, %s1238_s26   ;;  %s932_s25 = sphi %s996_s25, %s1237_s25   ;;  %s928_s24 = sphi %s994_s24, %s1236_s24  }
   0x5   : > { %s1019_s30 = sadd.s32 1, %s940_s27   ;;  %s180_s8 = sadd.s32 1, %s936_s26 }
   0x6   : > { %s177_s9 = ssub.s32 %s940_s27, %s1019_s30  ;;  %p190_p0 = scmp.ne.s32.totalorder %s936_s26, %s932_s25 }
   0x7   : > { %p178_p1 = scmp.eq.s32.totalorder %s177_s9, 0  ;;  %p191_p2 = scmp.eq.s32.totalorder %s1015_s28, 1 }
   0x8   : > { %p196_p3 = scmp.ne.s32.totalorder %s932_s25, %s928_s24  ;;  %p197_p4 = scmp.eq.s32.totalorder %s765_s29, 1 }
   0x9   : > { %s1030_s10 = scalar_select %p178_p1, %s936_s26, %s180_s8  }
   0xa   : > { %p1032_p5 = por %p191_p2, %p190_p0  ;;  %p1036_p6 = por %p197_p4, %p196_p3 }
   0xb   : > { %p766_p7 = scmp.ge.s32.totalorder %s940_s27, 1  ;;  %p204_p8 = scmp.lt.s32.totalorder %s940_s27, 3 }
   0xc   : > { %s1225_s12 = scalar_select %p1036_p6, 1, 0 }
   0xd   : > { %p801_p9 = scmp.eq.s32.totalorder %s1015_s28, 0  ;;  %p1043_p10 = pnand %p766_p7, %p204_p8 }
   0xe   : > { %s942_s14 = smov [#allocation2]  }
   0xf   : > { %s217_s15 = sshll.u32 %s942_s14, 4  ;;  %p793_p11 = pneg %p1043_p10  ;;  %s218_s15 = int_to_ptr.vmem [resolvable:$true] %s217_s15 }
  0x10   : > { %s861_s16 = scalar_lea.vmem %s218_s15, 32  ;;  %p869_p3 = scmp.lt.s32.totalorder %s218_s15, %s218_s15 }
  0x11   : > { %p794_p12 = pnand %p801_p9, %p793_p11  ;;  %p862_p0 = scmp.ne.s32.totalorder %s218_s15, %s861_s16 }
  0x12   : > { %p870_p4 = scmp.lt.s32.totalorder %s861_s16, %s861_s16 }
  0x13   : > { %p852_p13 = pneg %p794_p12 }
  0x14   : > { %p871_p6 = por %p870_p4, %p869_p3 }
  0x15   : > { %p864_p1 = pnand %p862_p0, %p852_p13 }
  0x17   : > { %p865_p2 = pneg %p864_p1 }
  0x19   : > { %p872_p7 = pnand %p871_p6, %p865_p2 }
  0x1b   : > { %875 = shalt.err (!%p872_p7)
}
  0x1c   : > { %796 = dma.hbm_to_vmem [thread:$0]  (!%p794_p12), %s1217_s1, 32, %s218_s15, [#allocation3]  }
  0x1d   : > { %253 = sbr.rel (%p1043_p10) target bundleno = 619 (0x26b), region = 48 }
  0x22   : > { %919 = dma.done.wait (%p801_p9), [#allocation3], 32  }
  0x23   : > { %921 = vsyncadd (%p801_p9), [#allocation3], 4294967264  ;;  %p285_p8 = scmp.lt.s32.totalorder %s1015_s28, 1  ;;  %v943_v0 = vmov 0.0   ;;  %v944_v1 = vmov 0   ;;  %vm298_vm0 = vcmask 1043456   ;;  %v396_v25 = vlaneseq }
  0x24   : > { %367 = vmatprep.mubr.f32.mxu0 %v943_v0  ;;  %642 = vmatprep.mubr.f32.mxu1 %v943_v0  ;;  %v374_v3 = vld [vmem:[%s1218_s2] sm:$0x3]  ;;  %vm294_vm1 = vcmask 31744   ;;  %s945_s14 = smov 16   ;;  %s946_s15 = smov 127   ;;  %vm482_vm4 = vcmask 1039360  }
  0x25   : > { %s286_s19 = scalar_select %p285_p8, %s1015_s28, 1  ;;  %847 = vset.pattern.permute.xlu0 %v944_v1  ;;  %848 = vset.pattern.permute.xlu1 %v944_v1  ;;  %v291_v5 = vld [vmem:[#allocation2] sm:$0x3]  ;;  %v397_v28 = vand.u32 127, %v396_v25  ;;  %vm512_vm5 = vcmask 908288   ;;  %vm448_vm6 = vcmask 130048  }
  0x26   : > { %377 = vperm.xlu0 %847, %v374_v3   ;;  %v382_v6 = vld [vmem:[%s1219_s3] sm:$0x3]  ;;  %s947_s16 = smov 15   ;;  %s948_s17 = smov 113   ;;  %vm493_vm8 = vcmask 924672   ;;  %vm553_vm9 = vcmask 1041408  }
  0x27   : > { %s785_s20 = sshll.u32 %s286_s19, 3  ;;  %s949_s18 = smov 17   ;;  %v649_v19 = vld [vmem:[%s1221_s5] sm:$0xf]  ;;  %v398_v31 = vadd.s32 128, %v397_v28  ;;  %v403_v35 = vand.u32 15, %v397_v28 }
  0x28   : > { %s289_s23 = scalar_lea.vmem %s1216_s0, %s785_s20  ;;  %s950_s19 = smov 1   ;;  %v657_v20 = vld [vmem:[%s1222_s6] sm:$0xf]  ;;  %vm456_vm10 = vcmask 121856   ;;  %vm433_vm11 = vcmask 138240   ;;  %vm471_vm12 = vcmask 7168  }
  0x29   : > { %v1065_v2 = vld [vmem:[%s289_s23] sm:$0xff]  ;;  %s951_s20 = smov 112   ;;  %s952_s21 = smov 111   ;;  %v410_v34 = vand.u32 15, %v398_v31  ;;  %vm1123_vm14 = vcmp.lt.s32.totalorder %v403_v35, 15  ;;  %vm1127_vm15 = vcmp.ge.s32.totalorder %v403_v35, 1 }
  0x2a   : > { %v1072_v4 = vcombine.high %v1065_v2, %v1065_v2  ;;  %385 = vperm.xlu0 %847, %v382_v6   ;;  %v567_v35 = vld [vmem:[%s1220_s4] sm:$0xf] }
  0x2b   : > { %vm1107_vm7 = vcmp.lt.s32.totalorder %v410_v34, 15  ;;  %vm1118_vm13 = vcmp.ge.s32.totalorder %v410_v34, 1 }
  0x2c   : > { %774 = vmatprep.subr.msk.mxu0 %vm298_vm0, %v1072_v4 }
  0x2d   : > { %775 = vmatpush1.msk.msra.mxu0 %vm298_vm0, %v1065_v2 }
  0x2e   : > { %776 = vmatmul.mubr.msk.f32.vlgmr.msra.gmra.mxu0 %vm294_vm1, %v291_v5  ;;  %vm504_vm1 = vcmask 916480  }
  0xa1   : > { %v378_v7 = vpop.permute.xlu0 %377 }
  0xa5   : > { %v386_v10 = vpop.permute.xlu0 %385 }
  0xee   : > { %v369_v8 = vpop.f32.mrf.mxu0 }
  0xef   : > { %v380_v9 = vmul.f32 %v378_v7, %v369_v8 }
  0xf0   : > { %v371_v11 = vpop.f32.mrf.mxu0 }
  0xf1   : > { %v388_v12 = vadd.f32 %v386_v10, %v380_v9  ;;  %v381_v13 = vmul.f32 %v378_v7, %v371_v11 }
  0xf3   : > { %vm390_vm2 = vcmp.gt.f32.partialorder %v388_v12, 0.0  ;;  %v392_v14 = vmul.f32 0.1, %v388_v12  ;;  %v389_v16 = vadd.f32 %v386_v10, %v381_v13 }
  0xf5   : > { %v1081_v15 = vsel %vm390_vm2, %v388_v12, %v392_v14  ;;  %v393_v17 = vmul.f32 0.1, %v389_v16  ;;  %vm391_vm3 = vcmp.gt.f32.partialorder %v389_v16, 0.0  ;;  %vm558_vm2 = vcmask 1045504  }
  0xf6   : > { %444 = vrot.lane.b32.xlu0 %v1081_v15, %s945_s14  ;;  %478 = vrot.lane.b32.xlu1 %v1081_v15, %s946_s15 }
  0xf7   : > { %v1087_v18 = vsel %vm391_vm3, %v389_v16, %v393_v17  ;;  %vm568_vm3 = vcmask 146432  }
  0xfa   : > { %452 = vrot.lane.b32.xlu0 %v1081_v15, %s947_s16  ;;  %489 = vrot.lane.b32.xlu1 %v1081_v15, %s948_s17 }
  0xfe   : > { %429 = vrot.lane.b32.xlu0 %v1081_v15, %s949_s18  ;;  %480 = vrot.lane.b32.xlu1 %v1087_v18, %s946_s15 }
 0x102   : > { %467 = vrot.lane.b32.xlu0 %v1081_v15, %s950_s19  ;;  %446 = vrot.lane.b32.xlu1 %v1087_v18, %s945_s14  ;;  %s282_s14 = sand.u32 1, %s932_s25  }
 0x103   : > { %s771_s15 = sshll.u32 %s282_s14, 3  ;;  %s680_s22 = scalar_lea.sflag [#allocation4], %s282_s14 }
 0x106   : > { %491 = vrot.lane.b32.xlu0 %v1087_v18, %s948_s17  ;;  %454 = vrot.lane.b32.xlu1 %v1087_v18, %s947_s16  ;;  %s786_s16 = sshll.u32 %s1015_s28, 7  ;;  %s284_s17 = scalar_lea.vmem [#allocation5], %s771_s15 }
 0x107   : > { %s953_s28 = smov [#allocation5]  }
 0x108   : > { %s880_s29 = sshll.u32 %s953_s28, 4  ;;  %s881_s29 = int_to_ptr.vmem [resolvable:$false] %s880_s29 }
 0x109   : > { %s882_s8 = scalar_lea.vmem %s881_s29, 256 }
 0x10a   : > { %502 = vrot.lane.b32.xlu0 %v1087_v18, %s951_s20  ;;  %510 = vrot.lane.b32.xlu1 %v1087_v18, %s952_s21 }
 0x10e   : > { %500 = vrot.lane.b32.xlu0 %v1081_v15, %s951_s20  ;;  %431 = vrot.lane.b32.xlu1 %v1087_v18, %s949_s18  ;;  %s694_s18 = sshll.u32 %s284_s17, 4  ;;  %s695_s18 = int_to_ptr.vmem [resolvable:$true] %s694_s18 }
 0x10f   : > { %s876_s23 = scalar_lea.vmem %s695_s18, 128  ;;  %p883_p11 = scmp.lt.s32.totalorder %s695_s18, %s881_s29 }
 0x110   : > { %p877_p6 = scmp.ne.s32.totalorder %s695_s18, %s876_s23  ;;  %p884_p12 = scmp.lt.s32.totalorder %s882_s8, %s876_s23 }
 0x112   : > { %652 = vperm.xlu0 %847, %v649_v19   ;;  %469 = vrot.lane.b32.xlu1 %v1087_v18, %s950_s19  ;;  %p878_p9 = pnand %p877_p6, %p1032_p5  ;;  %p885_p13 = por %p884_p12, %p883_p11 }
 0x114   : > { %p879_p10 = pneg %p878_p9 }
 0x116   : > { %508 = vrot.lane.b32.xlu1 %v1081_v15, %s952_s21  ;;  %s692_s21 = scalar_lea.hbm %s1223_s7, %s786_s16  ;;  %p886_p0 = pnand %p885_p13, %p879_p10 }
 0x11a   : > { %660 = vperm.xlu1 %848, %v657_v20  }
 0x168   : > { %v445_v21 = vpop.permute.xlu0 %444  ;;  %v479_v22 = vpop.permute.xlu1 %478 }
 0x169   : > { %v451_v42 = vsel %vm448_vm6, 0.0, %v445_v21 }
 0x16a   : > { %v520_v51 = vrot.slane %v451_v42, 6 }
 0x16c   : > { %v453_v23 = vpop.permute.xlu0 %452  ;;  %v490_v24 = vpop.permute.xlu1 %489 }
 0x16d   : > { %v460_v52 = vsel %vm456_vm10, 0.0, %v453_v23 }
 0x16e   : > { %v465_v16 = vsel %vm1123_vm14, %v460_v52, 0.0 }
 0x170   : > { %v430_v26 = vpop.permute.xlu0 %429  ;;  %v481_v27 = vpop.permute.xlu1 %480 }
 0x171   : > { %v486_v39 = vsel %vm482_vm4, %v481_v27, 0.0  ;;  %v483_v43 = vsel %vm482_vm4, %v479_v22, %v481_v27  ;;  %v437_v53 = vsel %vm433_vm11, 0.0, %v430_v26 }
 0x172   : > { %v488_v44 = vsel %vm1107_vm7, %v486_v39, 0.0  ;;  %v487_v54 = vsel %vm1123_vm14, %v483_v43, 0.0  ;;  %v442_v1 = vsel %vm1127_vm15, %v437_v53, 0.0 }
 0x173   : > { %v539_v56 = vrot.slane %v488_v44, 6  ;;  %v538_v3 = vrot.slane %v487_v54, 6  ;;  %v554_v17 = vsel %vm553_vm9, %v442_v1, %v520_v51 }
 0x174   : > { %v468_v29 = vpop.permute.xlu0 %467  ;;  %v447_v30 = vpop.permute.xlu1 %446 }
 0x175   : > { %v475_v57 = vsel %vm471_vm12, 0.0, %v468_v29  ;;  %v449_v60 = vsel %vm448_vm6, %v445_v21, %v447_v30  ;;  %v562_v21 = vsel %vm553_vm9, %v1087_v18, %v539_v56  ;;  %v561_v25 = vsel %vm553_vm9, %v1081_v15, %v538_v3 }
 0x176   : > { %v476_v7 = vsel %vm1127_vm15, %v475_v57, 0.0  ;;  %v521_v11 = vrot.slane %v449_v60, 6  ;;  %v526_v30 = vrot.slane %v465_v16, 4 }
 0x178   : > { %v492_v32 = vpop.permute.xlu0 %491  ;;  %v455_v33 = vpop.permute.xlu1 %454  ;;  %v556_v34 = vsel %vm298_vm0, %v554_v17, %v526_v30 }
 0x179   : > { %v497_v46 = vsel %vm493_vm8, %v492_v32, 0.0  ;;  %v494_v50 = vsel %vm493_vm8, %v490_v24, %v492_v32  ;;  %v457_v62 = vsel %vm456_vm10, %v453_v23, %v455_v33 }
 0x17a   : > { %v499_v58 = vsel %vm1118_vm13, %v497_v46, 0.0  ;;  %v498_v61 = vsel %vm1127_vm15, %v494_v50, 0.0  ;;  %v466_v13 = vsel %vm1107_vm7, %v457_v62, 0.0 }
 0x17b   : > { %v545_v8 = vrot.slane %v499_v58, 4  ;;  %v544_v12 = vrot.slane %v498_v61, 4  ;;  %v527_v27 = vrot.slane %v466_v13, 4 }
 0x17c   : > { %v503_v36 = vpop.permute.xlu0 %502  ;;  %v511_v37 = vpop.permute.xlu1 %510 }
 0x17d   : > { %v516_v40 = vsel %vm512_vm5, %v511_v37, 0.0  ;;  %v507_v63 = vsel %vm504_vm1, %v503_v36, 0.0  ;;  %v563_v31 = vsel %vm298_vm0, %v561_v25, %v544_v12 }
 0x17e   : > { %v518_v41 = vsel %vm1107_vm7, %v516_v40, 0.0  ;;  %v550_v14 = vrot.slane %v507_v63, 2 }
 0x17f   : > { %777 = vmatprep.subr.msk.mxu1 %vm553_vm9, %v518_v41 }
 0x180   : > { %v432_v47 = vpop.permute.xlu1 %431  ;;  %v501_v55 = vpop.permute.xlu0 %500 }
 0x181   : > { %v434_v59 = vsel %vm433_vm11, %v430_v26, %v432_v47  ;;  %v505_v5 = vsel %vm504_vm1, %v501_v55, %v503_v36  ;;  %v532_v26 = vrot.slane %v476_v7, 2 }
 0x182   : > { %v443_v9 = vsel %vm1118_vm13, %v434_v59, 0.0  ;;  %v549_v19 = vrot.slane %v505_v5, 2 }
 0x183   : > { %v555_v22 = vsel %vm553_vm9, %v443_v9, %v521_v11  ;;  %v559_v36 = vsel %vm558_vm2, %v556_v34, %v532_v26 }
 0x184   : > { %v470_v0 = vpop.permute.xlu1 %469  ;;  %v565_v32 = vsel %vm558_vm2, %v563_v31, %v549_v19  ;;  %v557_v15 = vsel %vm298_vm0, %v555_v22, %v527_v27 }
 0x185   : > { %v472_v6 = vsel %vm471_vm12, %v468_v29, %v470_v0  ;;  %v564_v29 = vsel %vm298_vm0, %v562_v21, %v545_v8 }
 0x186   : > { %v477_v10 = vsel %vm1118_vm13, %v472_v6, 0.0  ;;  %v566_v18 = vsel %vm558_vm2, %v564_v29, %v550_v14 }
 0x187   : > { %v533_v23 = vrot.slane %v477_v10, 2 }
 0x188   : > { %v509_v20 = vpop.permute.xlu1 %508 }
 0x189   : > { %v513_v24 = vsel %vm512_vm5, %v509_v20, %v511_v37  ;;  %v560_v33 = vsel %vm558_vm2, %v557_v15, %v533_v23 }
 0x18a   : > { %v517_v28 = vsel %vm1123_vm14, %v513_v24, 0.0 }
 0x18b   : > { %778 = vmatpush1.msk.msra.mxu1 %vm553_vm9, %v517_v28 }
 0x18c   : > { %606 = vmatprep.subr.mxu1 %v566_v18 }
 0x18d   : > { %607 = vmatpush1.msra.mxu1 %v565_v32  ;;  %v653_v37 = vpop.permute.xlu0 %652 }
 0x18e   : > { %608 = vmatprep.subr.mxu1 %v560_v33 }
 0x18f   : > { %609 = vmatpush1.msra.mxu1 %v559_v36 }
 0x190   : > { %779 = vmatmul.mubr.msk.f32.vlgmr.msra.gmra.mxu1 %vm568_vm3, %v567_v35 }
 0x195   : > { %v661_v39 = vpop.permute.xlu1 %660 }
 0x250   : > { %v644_v38 = vpop.f32.mrf.mxu1 }
 0x251   : > { %v655_v40 = vmul.f32 %v653_v37, %v644_v38 }
 0x252   : > { %v646_v41 = vpop.f32.mrf.mxu1 }
 0x253   : > { %v656_v42 = vmul.f32 %v653_v37, %v646_v41  ;;  %v663_v43 = vadd.f32 %v661_v39, %v655_v40 }
 0x255   : > { %v664_v44 = vadd.f32 %v661_v39, %v656_v42  ;;  %vm665_vm0 = vcmp.gt.f32.partialorder %v663_v43, 0.0  ;;  %v667_v45 = vmul.f32 0.1, %v663_v43 }
 0x257   : > { %vm666_vm4 = vcmp.gt.f32.partialorder %v664_v44, 0.0  ;;  %v668_v46 = vmul.f32 0.1, %v664_v44  ;;  %v669_v47 = vsel %vm665_vm0, %v663_v43, %v667_v45 }
 0x258   : > { %v672_v49 = vadd.f32 %v669_v47, %v1065_v2 }
 0x259   : > { %v670_v48 = vsel %vm666_vm4, %v664_v44, %v668_v46 }
 0x25a   : > { %v673_v50 = vadd.f32 %v670_v48, %v1072_v4 }
 0x25c   : > { %v676_v51 = vcombine.low %v672_v49, %v673_v50 }
 0x25e   : > { %678 = vst [vmem:[%s284_s17] sm:$0xff] %v676_v51 }
 0x25f   : > { %889 = shalt.err (!%p886_p0)
}
 0x260   : > { %s890_s9 = scalar_lea.hbm %s692_s21, 128  ;;  %s894_s15 = scalar_lea.hbm %s1223_s7, 256 }
 0x261   : > { %p891_p1 = scmp.ne.s32.totalorder %s692_s21, %s890_s9  ;;  %p895_p4 = scmp.lt.s32.totalorder %s692_s21, %s1223_s7 }
 0x262   : > { %p896_p7 = scmp.lt.s32.totalorder %s894_s15, %s890_s9 }
 0x263   : > { %p892_p2 = pnand %p891_p1, %p1032_p5 }
 0x264   : > { %p897_p8 = por %p896_p7, %p895_p4 }
 0x265   : > { %p893_p3 = pneg %p892_p2 }
 0x267   : > { %p898_p6 = pnand %p897_p8, %p893_p3 }
 0x269   : > { %901 = shalt.err (!%p898_p6)
}
 0x26a   : > { %791 = dma.vmem_to_hbm [thread:$0]  (%p1032_p5), %s695_s18, 128, %s692_s21, %s680_s22  }
 0x26b PF: > { %p803_p9 = scmp.ge.s32.totalorder %s940_s27, 2  ;;  %s706_s19 = sand.u32 1, %s928_s24  }
 0x26c   : > { %p1235_p10 = scmp.ne.s32.totalorder %s1225_s12, 0  ;;  %s707_s20 = scalar_lea.sflag [#allocation4], %s706_s19 }
 0x26e   : > { %p798_p11 = pnand %p803_p9, %p1235_p10 }
 0x270   : > { %p799_p12 = pneg %p798_p11 }
 0x272   : > { %923 = dma.done.wait (%p799_p12), %s707_s20, 128  }
 0x273   : > { %925 = vsyncadd (%p799_p12), %s707_s20, 4294967168  ;;  %p18_p13 = scmp.ge.s32.totalorder %s1019_s30, 4   ;;  %s1236_s24 = smov %s932_s25 }
 0x274   : > { %s1237_s25 = smov %s936_s26  ;;  %s1238_s26 = smov %s1030_s10 }
 0x275   : > { %s1239_s27 = smov %s1019_s30  ;;  %20 = sbr.rel (!%p18_p13) target bundleno = 4 (0x4), region = 88 }
 0x27a   :  { %712 = vsyncpa [#allocation3], 1 }
 0x27b   :  { %714 = vsyncpa [#allocation3 + $0x1], 1 }
 0x27c   :  { %715 = vsyncpa [#allocation4], 1 }
 0x27d   :  { %717 = vsyncpa [#allocation4 + $0x1], 1 }

</bundles_post_ra>
